<compile_context>
chip_gen: v6e
topology: v6e:2x2x1
jax: 0.10.0
libtpu: 0.0.40
codegen_flags: <defaults>
</compile_context>

<pallas_src>
import functools

import jax
import jax.numpy as jnp
from jax.experimental import pallas as pl
from jax.experimental.pallas import tpu as pltpu

EPS = 1e-5
LANE = 128


def _round_up(n, m):
    return (n + m - 1) // m * m


def _pad_to(a, size, axis):
    pad = size - a.shape[axis]
    if pad == 0:
        return a
    widths = [(0, 0)] * a.ndim
    widths[axis] = (0, pad)
    return jnp.pad(a, widths)


def _bn_relu_fused(y, gamma, beta, inv_n):
    """Training-mode BatchNorm1d (biased variance) + ReLU, fused affine, f32."""
    s = jnp.sum(y, axis=0, keepdims=True)
    ss = jnp.sum(y * y, axis=0, keepdims=True)
    mu = s * inv_n
    var = ss * inv_n - mu * mu
    scale = gamma * jax.lax.rsqrt(var + EPS)      # rsqrt -> EUP slot
    shift = beta - mu * scale
    return jnp.maximum(y * scale + shift, 0.0)


def batch_net_kernel(x_ref, w_ref, vec_ref, out_ref, *, batch):
    inv_n = jnp.float32(1.0 / batch)

    # Packed per-feature vectors (f32): rows 0..4 = g1, be1, g2, be2, b3.
    g1 = vec_ref[0:1, :]
    be1 = vec_ref[1:2, :]
    g2 = vec_ref[2:3, :]
    be2 = vec_ref[3:4, :]
    b3 = vec_ref[4:5, :]

    x = x_ref[...]                                               # bf16 (B, Dp)

    # layer1: Linear (bias dropped; cancelled by BN) -> BN -> ReLU
    h1 = jnp.dot(x, w_ref[0], preferred_element_type=jnp.float32)
    h1 = _bn_relu_fused(h1, g1, be1, inv_n)

    # layer2: Linear (bias dropped) -> BN -> ReLU
    h2 = jnp.dot(h1.astype(jnp.bfloat16), w_ref[1],
                 preferred_element_type=jnp.float32)
    h2 = _bn_relu_fused(h2, g2, be2, inv_n)

    # layer3: Linear (with bias); output block is lane-dense (Dp = k*128).
    out_ref[...] = (jnp.dot(h2.astype(jnp.bfloat16), w_ref[2],
                            preferred_element_type=jnp.float32)
                    + b3).astype(out_ref.dtype)


def batch_net_forward(x, params):
    (w1, g1, be1, w2, g2, be2, w3, b3) = params
    batch, in_dim = x.shape
    h1_dim, h2_dim, out_dim = w1.shape[1], w2.shape[1], w3.shape[1]

    # One common lane-padded width for every feature dim (zero padding is
    # exact: padded weight rows/cols are zero, padded BN columns normalize to
    # zero and feed zero weight rows downstream).
    dp = _round_up(max(in_dim, h1_dim, h2_dim, out_dim), LANE)

    def pad_w(w):
        return _pad_to(_pad_to(w, dp, 0), dp, 1)

    w_stack = jnp.stack([pad_w(w1), pad_w(w2), pad_w(w3)]).astype(jnp.bfloat16)

    vecs = jnp.zeros((8, dp), jnp.float32)
    vecs = vecs.at[0, :h1_dim].set(g1)
    vecs = vecs.at[1, :h1_dim].set(be1)
    vecs = vecs.at[2, :h2_dim].set(g2)
    vecs = vecs.at[3, :h2_dim].set(be2)
    vecs = vecs.at[4, :out_dim].set(b3)

    x_p = _pad_to(x, dp, 1).astype(jnp.bfloat16)

    vmem = pl.BlockSpec(memory_space=pltpu.MemorySpace.VMEM)
    out_p = pl.pallas_call(
        functools.partial(batch_net_kernel, batch=batch),
        out_shape=jax.ShapeDtypeStruct((batch, dp), jnp.float32),
        in_specs=[vmem, vmem, vmem],
        out_specs=vmem,
        compiler_params=pltpu.CompilerParams(vmem_limit_bytes=4 * 1024 * 1024),
    )(x_p, w_stack, vecs)

    return out_p[:, :out_dim]


def init_params(key, in_dim, n_hidden_1, n_hidden_2, out_dim):
    ks = jax.random.split(key, 4)
    # Linear weights stored (in, out) so the kernel does plain x @ W on the MXU.
    # b1/b2 are intentionally omitted (cancelled by training-mode BN).
    w1 = jax.random.uniform(ks[0], (in_dim, n_hidden_1), jnp.float32, -0.1, 0.1)
    w2 = jax.random.uniform(ks[1], (n_hidden_1, n_hidden_2), jnp.float32, -0.1, 0.1)
    w3 = jax.random.uniform(ks[2], (n_hidden_2, out_dim), jnp.float32, -0.1, 0.1)
    b3 = jax.random.uniform(ks[3], (out_dim,), jnp.float32, -0.1, 0.1)
    # BatchNorm affine params (PyTorch default init: weight=1, bias=0).
    g1 = jnp.ones((n_hidden_1,), jnp.float32)
    be1 = jnp.zeros((n_hidden_1,), jnp.float32)
    g2 = jnp.ones((n_hidden_2,), jnp.float32)
    be2 = jnp.zeros((n_hidden_2,), jnp.float32)
    return (w1, g1, be1, w2, g2, be2, w3, b3)


def reference_forward(x, params):
    """Full-precision f32 reference of the intended PyTorch forward pass."""
    (w1, g1, be1, w2, g2, be2, w3, b3) = params

    def bn_relu(y, g, b):
        mu = jnp.mean(y, axis=0, keepdims=True)
        var = jnp.mean((y - mu) ** 2, axis=0, keepdims=True)
        return jnp.maximum((y - mu) * jax.lax.rsqrt(var + EPS) * g + b, 0.0)

    h1 = bn_relu(x @ w1, g1, be1)
    h2 = bn_relu(h1 @ w2, g2, be2)
    return h2 @ w3 + b3


if __name__ == "__main__":
    batch, in_dim, n_hidden_1, n_hidden_2, out_dim = 8, 32, 64, 32, 16

    key = jax.random.PRNGKey(0)
    kx, kp = jax.random.split(key)
    x = jax.random.normal(kx, (batch, in_dim), jnp.float32)
    params = init_params(kp, in_dim, n_hidden_1, n_hidden_2, out_dim)

    out = batch_net_forward(x, params)
    jax.block_until_ready(out)

    ref = reference_forward(x, params)
    assert out.shape == (batch, out_dim)
    # bf16 MXU operands -> allow a few percent of mixed-precision drift.
    assert jnp.allclose(out, ref, atol=5e-2, rtol=5e-2), float(
        jnp.max(jnp.abs(out - ref)))

    print("KERNEL_OK")
</pallas_src>

<mosaic_0001>
module attributes {stable_mosaic.version = 11 : i64} {
  func.func @batch_net_kernel(%arg0: memref<8x128xbf16, #tpu.memory_space<vmem>>, %arg1: memref<3x128x128xbf16, #tpu.memory_space<vmem>>, %arg2: memref<8x128xf32, #tpu.memory_space<vmem>>, %arg3: memref<8x128xf32, #tpu.memory_space<vmem>>) attributes {dimension_semantics = [], scalar_prefetch = 0 : i64, scratch_operands = 0 : i64, tpu.core_type = #tpu.core_type<tc>} {
    %c0 = arith.constant 0 : index
    %c0_0 = arith.constant 0 : index
    %0 = vector.load %arg2[%c0, %c0_0] : memref<8x128xf32, #tpu.memory_space<vmem>>, vector<1x128xf32>
    %c1 = arith.constant 1 : index
    %c0_1 = arith.constant 0 : index
    %1 = vector.load %arg2[%c1, %c0_1] : memref<8x128xf32, #tpu.memory_space<vmem>>, vector<1x128xf32>
    %c2 = arith.constant 2 : index
    %c0_2 = arith.constant 0 : index
    %2 = vector.load %arg2[%c2, %c0_2] : memref<8x128xf32, #tpu.memory_space<vmem>>, vector<1x128xf32>
    %c3 = arith.constant 3 : index
    %c0_3 = arith.constant 0 : index
    %3 = vector.load %arg2[%c3, %c0_3] : memref<8x128xf32, #tpu.memory_space<vmem>>, vector<1x128xf32>
    %c4 = arith.constant 4 : index
    %c0_4 = arith.constant 0 : index
    %4 = vector.load %arg2[%c4, %c0_4] : memref<8x128xf32, #tpu.memory_space<vmem>>, vector<1x128xf32>
    %c0_5 = arith.constant 0 : index
    %c0_6 = arith.constant 0 : index
    %5 = vector.load %arg0[%c0_5, %c0_6] : memref<8x128xbf16, #tpu.memory_space<vmem>>, vector<8x128xbf16>
    %c0_7 = arith.constant 0 : index
    %c0_8 = arith.constant 0 : index
    %c0_9 = arith.constant 0 : index
    %6 = vector.load %arg1[%c0_7, %c0_8, %c0_9] : memref<3x128x128xbf16, #tpu.memory_space<vmem>>, vector<1x128x128xbf16>
    %7 = vector.shape_cast %6 : vector<1x128x128xbf16> to vector<128x128xbf16>
    %cst = arith.constant dense<0.000000e+00> : vector<8x128xf32>
    %8 = tpu.matmul %5, %7, %cst {dimension_numbers = #tpu.dot_dimension_numbers<[1], [0], [0], [1], [0, 0, 1, 1], [], []>} : vector<8x128xbf16>, vector<128x128xbf16>, vector<8x128xf32> -> vector<8x128xf32>
    %cst_10 = arith.constant dense<0.000000e+00> : vector<128xf32>
    %9 = vector.multi_reduction <add>, %8, %cst_10 [0] : vector<8x128xf32> to vector<128xf32>
    %10 = vector.shape_cast %9 : vector<128xf32> to vector<1x128xf32>
    %11 = arith.mulf %8, %8 : vector<8x128xf32>
    %cst_11 = arith.constant dense<0.000000e+00> : vector<128xf32>
    %12 = vector.multi_reduction <add>, %11, %cst_11 [0] : vector<8x128xf32> to vector<128xf32>
    %13 = vector.shape_cast %12 : vector<128xf32> to vector<1x128xf32>
    %cst_12 = arith.constant 1.250000e-01 : f32
    %14 = vector.broadcast %cst_12 : f32 to vector<1x128xf32>
    %15 = arith.mulf %10, %14 : vector<1x128xf32>
    %cst_13 = arith.constant 1.250000e-01 : f32
    %16 = vector.broadcast %cst_13 : f32 to vector<1x128xf32>
    %17 = arith.mulf %13, %16 : vector<1x128xf32>
    %18 = arith.mulf %15, %15 : vector<1x128xf32>
    %19 = arith.subf %17, %18 : vector<1x128xf32>
    %cst_14 = arith.constant 9.99999974E-6 : f32
    %20 = vector.broadcast %cst_14 : f32 to vector<1x128xf32>
    %21 = arith.addf %19, %20 : vector<1x128xf32>
    %22 = math.rsqrt %21 : vector<1x128xf32>
    %23 = arith.mulf %0, %22 : vector<1x128xf32>
    %24 = arith.mulf %15, %23 : vector<1x128xf32>
    %25 = arith.subf %1, %24 : vector<1x128xf32>
    %26 = vector.broadcast %23 : vector<1x128xf32> to vector<8x128xf32>
    %27 = arith.mulf %8, %26 : vector<8x128xf32>
    %28 = vector.broadcast %25 : vector<1x128xf32> to vector<8x128xf32>
    %29 = arith.addf %27, %28 : vector<8x128xf32>
    %cst_15 = arith.constant 0.000000e+00 : f32
    %30 = vector.broadcast %cst_15 : f32 to vector<8x128xf32>
    %31 = arith.maximumf %29, %30 : vector<8x128xf32>
    %32 = arith.truncf %31 : vector<8x128xf32> to vector<8x128xbf16>
    %c1_16 = arith.constant 1 : index
    %c0_17 = arith.constant 0 : index
    %c0_18 = arith.constant 0 : index
    %33 = vector.load %arg1[%c1_16, %c0_17, %c0_18] : memref<3x128x128xbf16, #tpu.memory_space<vmem>>, vector<1x128x128xbf16>
    %34 = vector.shape_cast %33 : vector<1x128x128xbf16> to vector<128x128xbf16>
    %cst_19 = arith.constant dense<0.000000e+00> : vector<8x128xf32>
    %35 = tpu.matmul %32, %34, %cst_19 {dimension_numbers = #tpu.dot_dimension_numbers<[1], [0], [0], [1], [0, 0, 1, 1], [], []>} : vector<8x128xbf16>, vector<128x128xbf16>, vector<8x128xf32> -> vector<8x128xf32>
    %cst_20 = arith.constant dense<0.000000e+00> : vector<128xf32>
    %36 = vector.multi_reduction <add>, %35, %cst_20 [0] : vector<8x128xf32> to vector<128xf32>
    %37 = vector.shape_cast %36 : vector<128xf32> to vector<1x128xf32>
    %38 = arith.mulf %35, %35 : vector<8x128xf32>
    %cst_21 = arith.constant dense<0.000000e+00> : vector<128xf32>
    %39 = vector.multi_reduction <add>, %38, %cst_21 [0] : vector<8x128xf32> to vector<128xf32>
    %40 = vector.shape_cast %39 : vector<128xf32> to vector<1x128xf32>
    %cst_22 = arith.constant 1.250000e-01 : f32
    %41 = vector.broadcast %cst_22 : f32 to vector<1x128xf32>
    %42 = arith.mulf %37, %41 : vector<1x128xf32>
    %cst_23 = arith.constant 1.250000e-01 : f32
    %43 = vector.broadcast %cst_23 : f32 to vector<1x128xf32>
    %44 = arith.mulf %40, %43 : vector<1x128xf32>
    %45 = arith.mulf %42, %42 : vector<1x128xf32>
    %46 = arith.subf %44, %45 : vector<1x128xf32>
    %cst_24 = arith.constant 9.99999974E-6 : f32
    %47 = vector.broadcast %cst_24 : f32 to vector<1x128xf32>
    %48 = arith.addf %46, %47 : vector<1x128xf32>
    %49 = math.rsqrt %48 : vector<1x128xf32>
    %50 = arith.mulf %2, %49 : vector<1x128xf32>
    %51 = arith.mulf %42, %50 : vector<1x128xf32>
    %52 = arith.subf %3, %51 : vector<1x128xf32>
    %53 = vector.broadcast %50 : vector<1x128xf32> to vector<8x128xf32>
    %54 = arith.mulf %35, %53 : vector<8x128xf32>
    %55 = vector.broadcast %52 : vector<1x128xf32> to vector<8x128xf32>
    %56 = arith.addf %54, %55 : vector<8x128xf32>
    %cst_25 = arith.constant 0.000000e+00 : f32
    %57 = vector.broadcast %cst_25 : f32 to vector<8x128xf32>
    %58 = arith.maximumf %56, %57 : vector<8x128xf32>
    %59 = arith.truncf %58 : vector<8x128xf32> to vector<8x128xbf16>
    %c2_26 = arith.constant 2 : index
    %c0_27 = arith.constant 0 : index
    %c0_28 = arith.constant 0 : index
    %60 = vector.load %arg1[%c2_26, %c0_27, %c0_28] : memref<3x128x128xbf16, #tpu.memory_space<vmem>>, vector<1x128x128xbf16>
    %61 = vector.shape_cast %60 : vector<1x128x128xbf16> to vector<128x128xbf16>
    %cst_29 = arith.constant dense<0.000000e+00> : vector<8x128xf32>
    %62 = tpu.matmul %59, %61, %cst_29 {dimension_numbers = #tpu.dot_dimension_numbers<[1], [0], [0], [1], [0, 0, 1, 1], [], []>} : vector<8x128xbf16>, vector<128x128xbf16>, vector<8x128xf32> -> vector<8x128xf32>
    %63 = vector.broadcast %4 : vector<1x128xf32> to vector<8x128xf32>
    %64 = arith.addf %62, %63 : vector<8x128xf32>
    %c0_30 = arith.constant 0 : index
    %c0_31 = arith.constant 0 : index
    %65 = vector.load %arg3[%c0_30, %c0_31] : memref<8x128xf32, #tpu.memory_space<vmem>>, vector<8x128xf32>
    tpu.vector_store %arg3[%c0_30, %c0_31], %64 {strides = array<i32>} : memref<8x128xf32, #tpu.memory_space<vmem>>, vector<8x128xf32>,
    return
  }
}

</mosaic_0001>

<bundles_post_ra>
// kernel: tpu_custom_call.1
= control target key start
LH: loop header
LB: loop body
LE: loop exit
PB: predicated region body
PF: predicated region fallthrough
CT: control target
= control target key end

     0   :  { %8 = vsyncpa [#allocation3], 0  ;;  %s772_s0 = inlined_call_operand.hbm [shape: bf16[8,128], index: 0, kind: input, shape index: {}]   ;;  %s773_s1 = inlined_call_operand.hbm [shape: bf16[3,128,128], index: 1, kind: input, shape index: {}]   ;;  %s774_s2 = inlined_call_operand.hbm [shape: f32[8,128], index: 2, kind: input, shape index: {}]   ;;  %s775_s3 = inlined_call_operand.hbm [shape: f32[8,128], index: 3, kind: output, shape index: {}]  }
   0x1   :  { %9 = vsyncpa [#allocation6], 0 }
   0x2   :  { %10 = vsyncpa [#allocation4], 0  ;;  %s696_s12 = smov [#allocation5]  }
   0x3   :  { %s26_s13 = sshll.u32 %s696_s12, 4  ;;  %s27_s13 = int_to_ptr.vmem [resolvable:$true] %s26_s13 }
   0x4   :  { %s618_s14 = scalar_lea.vmem %s27_s13, 3072  ;;  %p623_p1 = scmp.lt.s32.totalorder %s27_s13, %s27_s13 }
   0x5   :  { %p619_p0 = scmp.ne.s32.totalorder %s27_s13, %s618_s14  ;;  %p624_p2 = scmp.lt.s32.totalorder %s618_s14, %s618_s14 }
   0x7   :  { %p625_p3 = por %p624_p2, %p623_p1 }
   0x9   :  { %p626_p4 = pnand %p625_p3, %p619_p0 }
   0xb   :  { %629 = shalt.err (!%p626_p4)
}
   0xc   :  { %s697_s15 = smov 64   ;;  %s698_s16 = smov 4  }
   0xd   :  { %32 = dma.hbm_to_vmem [thread:$0]  %s773_s1, 3072, %s27_s13, [#allocation6], %s697_s15, %s697_s15, %s698_s16  }
   0xe   :  { %s699_s19 = smov [#allocation2]   ;;  %s700_s21 = smov [#allocation7]  }
   0xf   :  { %s17_s20 = sshll.u32 %s699_s19, 4  ;;  %s39_s22 = sshll.u32 %s700_s21, 4  ;;  %s18_s20 = int_to_ptr.vmem [resolvable:$true] %s17_s20  ;;  %s40_s22 = int_to_ptr.vmem [resolvable:$true] %s39_s22 }
  0x10   :  { %s638_s23 = scalar_lea.vmem %s18_s20, 64  ;;  %p643_p6 = scmp.lt.s32.totalorder %s18_s20, %s18_s20 }
  0x11   :  { %p639_p5 = scmp.ne.s32.totalorder %s18_s20, %s638_s23  ;;  %p644_p7 = scmp.lt.s32.totalorder %s638_s23, %s638_s23 }
  0x13   :  { %p645_p8 = por %p644_p7, %p643_p6 }
  0x15   :  { %p646_p9 = pnand %p645_p8, %p639_p5 }
  0x17   :  { %649 = shalt.err (!%p646_p9)
}
  0x18   :  { %20 = dma.hbm_to_vmem [thread:$0]  %s772_s0, 64, %s18_s20, [#allocation3]  }
  0x19   :  { %s658_s26 = scalar_lea.vmem %s40_s22, 128  ;;  %p663_p11 = scmp.lt.s32.totalorder %s40_s22, %s40_s22 }
  0x1a   :  { %p659_p10 = scmp.ne.s32.totalorder %s40_s22, %s658_s26  ;;  %p664_p12 = scmp.lt.s32.totalorder %s658_s26, %s658_s26 }
  0x1c   :  { %p665_p13 = por %p664_p12, %p663_p11 }
  0x1e   :  { %p666_p0 = pnand %p665_p13, %p659_p10 }
  0x20   :  { %669 = shalt.err (!%p666_p0)
}
  0x21   :  { %42 = dma.hbm_to_vmem [thread:$0]  %s774_s2, 128, %s40_s22, [#allocation6]  }
  0x22   :  { %690 = dma.done.wait [#allocation3], 64  }
  0x23   :  { %691 = vsyncadd [#allocation3], 4294967232 }
  0x24   :  { %692 = dma.done.wait [#allocation6], 3200  }
  0x25   :  { %693 = vsyncadd [#allocation6], 4294964096  ;;  %v701_v0 = vmov 0.0   ;;  %vm702_vm0 = vmmov 0   ;;  %v582_v1 = vld [vmem:[#allocation5 + $0x38] sm:$0xff]   ;;  %v583_v2 = vld [vmem:[#allocation5 + $0x30] sm:$0xff]   ;;  %v185_v40 = vlaneseq }
  0x26   :  { %514 = vmatprep.subr.bf16.mxu0 %v701_v0  ;;  %530 = vmatprep.mubr.msk.bf16.mxu0 %vm702_vm0, %v701_v0  ;;  %v584_v3 = vld [vmem:[#allocation5 + $0x28] sm:$0xff]   ;;  %v585_v4 = vld [vmem:[#allocation5 + $0x20] sm:$0xff]   ;;  %v586_v5 = vld [vmem:[#allocation5 + $0x18] sm:$0xff]   ;;  %s703_s0 = smov [#allocation8]  }
  0x27   :  { %534 = vmatprep.subr.bf16.mxu1 %v701_v0  ;;  %550 = vmatprep.mubr.msk.bf16.mxu1 %vm702_vm0, %v701_v0  ;;  %v587_v6 = vld [vmem:[#allocation5 + $0x10] sm:$0xff]   ;;  %v588_v7 = vld [vmem:[#allocation5 + $0x8] sm:$0xff]   ;;  %v589_v8 = vld [vmem:[#allocation5] sm:$0xff]   ;;  %v186_v41 = vshrl.u32 %v185_v40, 7  ;;  %s452_s2 = sshll.u32 %s703_s0, 4  ;;  %s453_s2 = int_to_ptr.vmem [resolvable:$true] %s452_s2 }
  0x28   :  { %515 = vmatpush3.bf16.msra.mxu0 %v582_v1  ;;  %v58_v9 = vld [vmem:[#allocation2] sm:$0xf]  ;;  %v591_v11 = vld [vmem:[#allocation5 + $0x70] sm:$0xff]   ;;  %v592_v12 = vld [vmem:[#allocation5 + $0x68] sm:$0xff]   ;;  %s670_s28 = scalar_lea.vmem %s453_s2, 128  ;;  %p675_p2 = scmp.lt.s32.totalorder %s453_s2, %s453_s2 }
  0x29   :  { %516 = vmatprep.subr.bf16.mxu0 %v701_v0  ;;  %v590_v10 = vld [vmem:[#allocation5 + $0x78] sm:$0xff]   ;;  %v593_v13 = vld [vmem:[#allocation5 + $0x60] sm:$0xff]   ;;  %v595_v15 = vld [vmem:[#allocation5 + $0x50] sm:$0xff]   ;;  %v756_v43 = vsub.s32 0, %v186_v41  ;;  %p671_p1 = scmp.ne.s32.totalorder %s453_s2, %s670_s28  ;;  %p676_p3 = scmp.lt.s32.totalorder %s670_s28, %s670_s28 }
  0x2a   :  { %535 = vmatpush3.bf16.msra.mxu1 %v590_v10  ;;  %v594_v14 = vld [vmem:[#allocation5 + $0x58] sm:$0xff]   ;;  %v596_v16 = vld [vmem:[#allocation5 + $0x48] sm:$0xff]   ;;  %v597_v17 = vld [vmem:[#allocation5 + $0x40] sm:$0xff]  }
  0x2b   :  { %536 = vmatprep.subr.bf16.mxu1 %v701_v0  ;;  %v53_v42 = vld [vmem:[#allocation7] sm:$0x1]  ;;  %v54_v46 = vld [vmem:[#allocation7 + $0x1] sm:$0x1]  ;;  %v598_v55 = vld [vmem:[#allocation5 + $0xb8] sm:$0xff]   ;;  %p677_p4 = por %p676_p3, %p675_p2 }
  0x2c   :  { %517 = vmatpush3.bf16.msra.mxu0 %v583_v2  ;;  %v599_v56 = vld [vmem:[#allocation5 + $0xb0] sm:$0xff]   ;;  %v600_v57 = vld [vmem:[#allocation5 + $0xa8] sm:$0xff]   ;;  %v601_v58 = vld [vmem:[#allocation5 + $0xa0] sm:$0xff]  }
  0x2d   :  { %518 = vmatprep.subr.bf16.mxu0 %v701_v0  ;;  %v602_v59 = vld [vmem:[#allocation5 + $0x98] sm:$0xff]   ;;  %v603_v60 = vld [vmem:[#allocation5 + $0x90] sm:$0xff]   ;;  %v604_v61 = vld [vmem:[#allocation5 + $0x88] sm:$0xff]   ;;  %p678_p5 = pnand %p677_p4, %p671_p1 }
  0x2e   :  { %537 = vmatpush3.bf16.msra.mxu1 %v591_v11  ;;  %v605_v62 = vld [vmem:[#allocation5 + $0x80] sm:$0xff]  }
  0x2f   :  { %538 = vmatprep.subr.bf16.mxu1 %v701_v0 }
  0x30   :  { %519 = vmatpush3.bf16.msra.mxu0 %v584_v3 }
  0x31   :  { %520 = vmatprep.subr.bf16.mxu0 %v701_v0 }
  0x32   :  { %539 = vmatpush3.bf16.msra.mxu1 %v592_v12 }
  0x33   :  { %540 = vmatprep.subr.bf16.mxu1 %v701_v0 }
  0x34   :  { %521 = vmatpush3.bf16.msra.mxu0 %v585_v4 }
  0x35   :  { %522 = vmatprep.subr.bf16.mxu0 %v701_v0 }
  0x36   :  { %541 = vmatpush3.bf16.msra.mxu1 %v593_v13 }
  0x37   :  { %542 = vmatprep.subr.bf16.mxu1 %v701_v0 }
  0x38   :  { %523 = vmatpush3.bf16.msra.mxu0 %v586_v5 }
  0x39   :  { %524 = vmatprep.subr.bf16.mxu0 %v701_v0 }
  0x3a   :  { %543 = vmatpush3.bf16.msra.mxu1 %v594_v14 }
  0x3b   :  { %544 = vmatprep.subr.bf16.mxu1 %v701_v0 }
  0x3c   :  { %525 = vmatpush3.bf16.msra.mxu0 %v587_v6 }
  0x3d   :  { %526 = vmatprep.subr.bf16.mxu0 %v701_v0 }
  0x3e   :  { %545 = vmatpush3.bf16.msra.mxu1 %v595_v15 }
  0x3f   :  { %546 = vmatprep.subr.bf16.mxu1 %v701_v0 }
  0x40   :  { %527 = vmatpush3.bf16.msra.mxu0 %v588_v7 }
  0x41   :  { %528 = vmatprep.subr.bf16.mxu0 %v701_v0 }
  0x42   :  { %547 = vmatpush3.bf16.msra.mxu1 %v596_v16 }
  0x43   :  { %548 = vmatprep.subr.bf16.mxu1 %v701_v0 }
  0x44   :  { %529 = vmatpush3.bf16.msra.mxu0 %v589_v8 }
  0x45   :  { %554 = vmatprep.subr.bf16.mxu0 %v701_v0 }
  0x46   :  { %549 = vmatpush3.bf16.msra.mxu1 %v597_v17 }
  0x47   :  { %531 = vmatmul.mubr.bf16.vlgmr.msra.gmra.mxu0 %v58_v9 }
  0x48   :  { %570 = vmatprep.mubr.msk.bf16.mxu0 %vm702_vm0, %v701_v0  ;;  %555 = vmatpush3.bf16.msra.mxu0 %v598_v55 }
  0x49   :  { %556 = vmatprep.subr.bf16.mxu0 %v701_v0 }
  0x4c   :  { %557 = vmatpush3.bf16.msra.mxu0 %v599_v56 }
  0x4d   :  { %558 = vmatprep.subr.bf16.mxu0 %v701_v0 }
  0x50   :  { %559 = vmatpush3.bf16.msra.mxu0 %v600_v57 }
  0x51   :  { %560 = vmatprep.subr.bf16.mxu0 %v701_v0 }
  0x54   :  { %561 = vmatpush3.bf16.msra.mxu0 %v601_v58 }
  0x55   :  { %562 = vmatprep.subr.bf16.mxu0 %v701_v0 }
  0x58   :  { %563 = vmatpush3.bf16.msra.mxu0 %v602_v59 }
  0x59   :  { %564 = vmatprep.subr.bf16.mxu0 %v701_v0 }
  0x5c   :  { %565 = vmatpush3.bf16.msra.mxu0 %v603_v60 }
  0x5d   :  { %566 = vmatprep.subr.bf16.mxu0 %v701_v0 }
  0x60   :  { %567 = vmatpush3.bf16.msra.mxu0 %v604_v61 }
  0x61   :  { %568 = vmatprep.subr.bf16.mxu0 %v701_v0 }
  0x64   :  { %569 = vmatpush3.bf16.msra.mxu0 %v605_v62 }
 0x107   :  { %v157_v18 = vpop.f32.mrf.mxu0 }
 0x108   :  { %v163_v19 = vrot.slane %v157_v18, 4  ;;  %v169_v20 = vmul.f32 %v157_v18, %v157_v18 }
 0x109   :  { %v532_v21 = vpop.f32.mrf.mxu0 }
 0x10a   :  { %v164_v22 = vadd.f32 %v163_v19, %v157_v18  ;;  %v170_v23 = vrot.slane %v169_v20, 4  ;;  %v55_v21 = vld [vmem:[#allocation7 + $0x2] sm:$0x1] }
 0x10b   :  { %v160_v24 = vpop.f32.mrf.mxu0 }
 0x10c   :  { %v165_v25 = vrot.slane %v164_v22, 2  ;;  %v171_v26 = vadd.f32 %v170_v23, %v169_v20  ;;  %v56_v24 = vld [vmem:[#allocation7 + $0x3] sm:$0x1] }
 0x10d   :  { %v533_v27 = vpop.f32.mrf.mxu0 }
 0x10e   :  { %v166_v28 = vadd.f32 %v165_v25, %v164_v22  ;;  %v172_v29 = vrot.slane %v171_v26, 2 }
 0x110   :  { %v167_v30 = vrot.slane %v166_v28, 1  ;;  %v173_v31 = vadd.f32 %v172_v29, %v171_v26 }
 0x112   :  { %v168_v32 = vadd.f32 %v167_v30, %v166_v28  ;;  %v174_v33 = vrot.slane %v173_v31, 1 }
 0x114   :  { %v175_v34 = vadd.f32 %v174_v33, %v173_v31  ;;  %v176_v35 = vmul.f32 0.125, %v168_v32  ;;  %v478_v33 = vld [vmem:[#allocation7 + $0x4] ss:$0 sm:$0xff] }
 0x116   :  { %v177_v36 = vmul.f32 0.125, %v175_v34  ;;  %v178_v37 = vmul.f32 %v176_v35, %v176_v35 }
 0x118   :  { %v179_v38 = vsub.f32 %v177_v36, %v178_v37 }
 0x11a   :  { %v180_v39 = vadd.f32 1e-05, %v179_v38 }
 0x11c   :  { %606 = vrsqrt.f32 %v180_v39 }
 0x129   :  { %v607_v44 = vpop.eup %606 }
 0x12a   :  { %v182_v45 = vmul.f32 %v607_v44, %v53_v42 }
 0x12c   :  { %v188_v47 = vrot.slane %v182_v45, %v756_v43  ;;  %v183_v48 = vmul.f32 %v182_v45, %v176_v35 }
 0x12e   :  { %v184_v49 = vsub.f32 %v54_v46, %v183_v48  ;;  %v189_v50 = vmul.f32 %v188_v47, %v157_v18 }
 0x130   :  { %v193_v51 = vrot.slane %v184_v49, %v756_v43 }
 0x132   :  { %v194_v52 = vadd.f32 %v193_v51, %v189_v50 }
 0x134   :  { %v195_v53 = vmax.f32 %v194_v52, 0.0 }
 0x136   :  { %v196_v54 = vpack.c.bf16 %v195_v53, %v195_v53 }
 0x138   :  { %551 = vmatmul.mubr.bf16.vlgmr.msra.gmra.mxu1 %v196_v54 }
 0x1f8   :  { %v296_v63 = vpop.f32.mrf.mxu1 }
 0x1f9   :  { %v302_v1 = vrot.slane %v296_v63, 4  ;;  %v308_v2 = vmul.f32 %v296_v63, %v296_v63 }
 0x1fa   :  { %v552_v3 = vpop.f32.mrf.mxu1 }
 0x1fb   :  { %v303_v4 = vadd.f32 %v302_v1, %v296_v63  ;;  %v309_v5 = vrot.slane %v308_v2, 4 }
 0x1fc   :  { %v299_v6 = vpop.f32.mrf.mxu1 }
 0x1fd   :  { %v304_v7 = vrot.slane %v303_v4, 2  ;;  %v310_v8 = vadd.f32 %v309_v5, %v308_v2 }
 0x1fe   :  { %v553_v9 = vpop.f32.mrf.mxu1 }
 0x1ff   :  { %v305_v10 = vadd.f32 %v304_v7, %v303_v4  ;;  %v311_v11 = vrot.slane %v310_v8, 2 }
 0x201   :  { %v306_v12 = vrot.slane %v305_v10, 1  ;;  %v312_v13 = vadd.f32 %v311_v11, %v310_v8 }
 0x203   :  { %v307_v14 = vadd.f32 %v306_v12, %v305_v10  ;;  %v313_v15 = vrot.slane %v312_v13, 1 }
 0x205   :  { %v314_v16 = vadd.f32 %v313_v15, %v312_v13  ;;  %v315_v0 = vmul.f32 0.125, %v307_v14 }
 0x207   :  { %v316_v17 = vmul.f32 0.125, %v314_v16  ;;  %v317_v18 = vmul.f32 %v315_v0, %v315_v0 }
 0x209   :  { %v318_v19 = vsub.f32 %v316_v17, %v317_v18 }
 0x20b   :  { %v319_v20 = vadd.f32 1e-05, %v318_v19 }
 0x20d   :  { %608 = vrsqrt.f32 %v319_v20 }
 0x21a   :  { %v609_v22 = vpop.eup %608 }
 0x21b   :  { %v321_v23 = vmul.f32 %v609_v22, %v55_v21 }
 0x21d   :  { %v322_v25 = vmul.f32 %v321_v23, %v315_v0  ;;  %v327_v26 = vrot.slane %v321_v23, %v756_v43 }
 0x21f   :  { %v323_v27 = vsub.f32 %v56_v24, %v322_v25  ;;  %v328_v28 = vmul.f32 %v327_v26, %v296_v63 }
 0x221   :  { %v332_v29 = vrot.slane %v323_v27, %v756_v43 }
 0x223   :  { %v333_v30 = vadd.f32 %v332_v29, %v328_v28 }
 0x225   :  { %v334_v31 = vmax.f32 %v333_v30, 0.0 }
 0x227   :  { %v335_v32 = vpack.c.bf16 %v334_v31, %v334_v31 }
 0x229   :  { %571 = vmatmul.mubr.bf16.vlgmr.msra.gmra.mxu0 %v335_v32 }
 0x2e9   :  { %v439_v34 = vpop.f32.mrf.mxu0 }
 0x2ea   :  { %v440_v35 = vadd.f32 %v478_v33, %v439_v34 }
 0x2eb   :  { %v572_v36 = vpop.f32.mrf.mxu0 }
 0x2ec   :  { %445 = vst [vmem:[#allocation8] sm:$0xff] %v440_v35 }
 0x2ed   :  { %v442_v37 = vpop.f32.mrf.mxu0 }
 0x2ee   :  { %681 = shalt.err (!%p678_p5)
}
 0x2ef   :  { %455 = dma.vmem_to_hbm [thread:$0]  %s453_s2, 128, %s775_s3, [#allocation4]   ;;  %v573_v38 = vpop.f32.mrf.mxu0 }
 0x2f0   :  { %694 = dma.done.wait [#allocation4], 128  }
 0x2f1   :  { %695 = vsyncadd [#allocation4], 4294967168 }
 0x2f2   :  { %459 = vsyncpa [#allocation3], 1 }
 0x2f3   :  { %460 = vsyncpa [#allocation6], 1 }
 0x2f4   :  { %461 = vsyncpa [#allocation4], 1 }

</bundles_post_ra>
